<compile_context>
chip_gen: v5e
topology: v5e:2x2
jax: 0.10.0
libtpu: 0.0.40
codegen_flags: <defaults>
</compile_context>

<pallas_src>
import functools

import jax
import jax.numpy as jnp
from jax import lax
from jax.experimental import pallas as pl
from jax.experimental.pallas import tpu as pltpu


def _softplus(x):
    # -logsigmoid(z) = softplus(-z); numerically stable softplus.
    return jnp.maximum(x, 0.0) + jnp.log1p(jnp.exp(-jnp.abs(x)))


def _tree_sum(xs):
    # Balanced pairwise reduction (log-depth dependency chain).
    xs = list(xs)
    while len(xs) > 1:
        nxt = [xs[k] + xs[k + 1] for k in range(0, len(xs) - 1, 2)]
        if len(xs) % 2:
            nxt.append(xs[-1])
        xs = nxt
    return xs[0]


def _siglip_kernel(scale_ref, bias_ref, img_ref, txt_ref, out_ref, acc_ref, *, tm, tn):
    j = pl.program_id(1)
    nj = pl.num_programs(1)

    @pl.when(j == 0)
    def _():
        acc_ref[...] = jnp.zeros_like(acc_ref)

    # (tm, D) @ (tn, D)^T -> (tm, tn) on the MXU; bf16 inputs, f32 accumulation.
    logits = lax.dot_general(
        img_ref[...], txt_ref[...],
        dimension_numbers=(((1,), (1,)), ((), ())),
        preferred_element_type=jnp.float32,
    )
    scale = scale_ref[0, 0]
    bias = bias_ref[0, 0]

    # Fused scale/bias + softplus per 128-lane column chunk, folded straight
    # into a (tm, 128) running partial (live set stays O(tm x 128), never the
    # full (tm, tn) softplus result).  Branch-free: the diagonal (+1 labels)
    # and zero-padding are corrected exactly in the wrapper.
    part = _softplus(logits[:, 0:128] * scale + bias)
    for c in range(1, tn // 128):
        part = part + _softplus(logits[:, c * 128:(c + 1) * 128] * scale + bias)
    acc_ref[...] += part

    @pl.when(j == nj - 1)
    def _():
        # Tree-fold the (tm, 128) accumulator into a lane-dense (8, 128) partial.
        out_ref[...] = _tree_sum(
            [acc_ref[b * 8:(b + 1) * 8, :] for b in range(tm // 8)]
        )


def _round_up(x, m):
    return (x + m - 1) // m * m


def _cdiv(a, b):
    return -(-a // b)


@functools.partial(jax.jit, static_argnames=("tm_max", "tn_max"))
def siglip_loss(image_features, text_features, logit_scale, logit_bias,
                *, tm_max=1024, tn_max=512):
    B_img, D = image_features.shape
    B_txt, D2 = text_features.shape
    assert D == D2

    # --- tile-size selection (static Python ints) ----------------------------
    # Image axis: arithmetic intensity vs the streamed text tiles is ~tm
    # FLOP/byte, so make tm large; choose it from num_i so padding stays small,
    # round to 16 (bf16 native (16,128) tile), and keep num_i >= 2 for large
    # batches so v7x's second TensorCore gets work.
    num_i = max(1, _cdiv(B_img, tm_max))
    if B_img >= 512 and num_i < 2:
        num_i = 2
    tm = _round_up(_cdiv(B_img, num_i), 16)
    # Text axis: big enough that per-grid-step work dwarfs the ~0.35us step
    # overhead; multiple of 128 (lane width); padding minimised via num_j.
    num_j = max(1, _cdiv(B_txt, tn_max))
    tn = _round_up(_cdiv(B_txt, num_j), 128)

    Bi_p = num_i * tm
    Bt_p = num_j * tn

    # bf16 inputs: half the DMA bytes, 2x MXU throughput; f32 accumulation in-kernel.
    img = image_features.astype(jnp.bfloat16)
    txt = text_features.astype(jnp.bfloat16)
    if Bi_p != B_img:
        img = jnp.pad(img, ((0, Bi_p - B_img), (0, 0)))
    if Bt_p != B_txt:
        txt = jnp.pad(txt, ((0, Bt_p - B_txt), (0, 0)))

    scale = jnp.asarray(logit_scale, jnp.float32).reshape(1, 1)
    bias = jnp.asarray(logit_bias, jnp.float32).reshape(1, 1)

    # VMEM footprint: double-buffered image/text tiles (bf16), (tm,128) f32
    # accumulator, (tm,tn) f32 matmul intermediate, output blocks.  Sized
    # explicitly (with 2x headroom) so we don't over-reserve v7x's 64 MiB VMEM.
    vmem_bytes = (2 * (tm + tn) * D) * 2 + tm * 128 * 4 + tm * tn * 4 + 2 * 8 * 128 * 4
    vmem_limit = int(min(40 * 1024 * 1024, max(24 * 1024 * 1024, 2 * vmem_bytes)))

    kernel = functools.partial(_siglip_kernel, tm=tm, tn=tn)

    partials = pl.pallas_call(
        kernel,
        out_shape=jax.ShapeDtypeStruct((num_i * 8, 128), jnp.float32),
        grid_spec=pltpu.PrefetchScalarGridSpec(
            num_scalar_prefetch=0,
            grid=(num_i, num_j),
            in_specs=[
                pl.BlockSpec(memory_space=pltpu.MemorySpace.SMEM),   # scale (1,1)
                pl.BlockSpec(memory_space=pltpu.MemorySpace.SMEM),   # bias  (1,1)
                pl.BlockSpec((tm, D), lambda i, j: (i, 0)),          # image tile (resident over j)
                pl.BlockSpec((tn, D), lambda i, j: (j, 0)),          # text tile (streamed over j)
            ],
            out_specs=pl.BlockSpec((8, 128), lambda i, j: (i, 0)),   # per-i lane-dense partials
            scratch_shapes=[pltpu.VMEM((tm, 128), jnp.float32)],
        ),
        compiler_params=pltpu.CompilerParams(
            dimension_semantics=("parallel", "arbitrary"),
            vmem_limit_bytes=vmem_limit,
        ),
    )(scale, bias, img, txt)

    total = jnp.sum(partials)

    scale_f = jnp.asarray(logit_scale, jnp.float32)
    bias_f = jnp.asarray(logit_bias, jnp.float32)

    # (a) Padding correction: padded rows/cols are zero vectors, so each padded
    #     entry's logit is exactly `bias` and contributed softplus(bias).
    n_pad = Bi_p * Bt_p - B_img * B_txt
    total = total - jnp.float32(n_pad) * _softplus(bias_f)

    # (b) Diagonal correction (labels +1): softplus(-z) = softplus(z) - z, so
    #     subtract sum over the valid diagonal of z_ii = scale*<img_i,txt_i>+bias
    #     (bf16-rounded features, matching the kernel's matmul inputs).
    n_diag = min(B_img, B_txt)
    diag_dot = jnp.sum(
        image_features[:n_diag].astype(jnp.bfloat16).astype(jnp.float32)
        * text_features[:n_diag].astype(jnp.bfloat16).astype(jnp.float32)
    )
    total = total - (scale_f * diag_dot + jnp.float32(n_diag) * bias_f)

    return total / jnp.float32(B_img)


def _reference_loss(image_features, text_features, logit_scale, logit_bias):
    logits = logit_scale * image_features @ text_features.T + logit_bias
    n, m = logits.shape
    labels = 2.0 * jnp.eye(n, m, dtype=logits.dtype) - jnp.ones((n, m), logits.dtype)
    mat = -jax.nn.log_sigmoid(labels * logits)
    return mat.sum() / image_features.shape[0]


if __name__ == "__main__":
    key = jax.random.PRNGKey(0)
    k1, k2, k3, k4 = jax.random.split(key, 4)

    def _make(k, b, d):
        x = jax.random.normal(k, (b, d), dtype=jnp.float32)
        return x / jnp.linalg.norm(x, axis=-1, keepdims=True)

    logit_scale = jnp.float32(10.0)
    logit_bias = jnp.float32(-10.0)

    # Case 1: standard square SigLIP batch (small synthetic shapes).
    B, D = 16, 32
    img = _make(k1, B, D)
    txt = _make(k2, B, D)
    out = jax.block_until_ready(siglip_loss(img, txt, logit_scale, logit_bias))
    # Reference on the same bf16-rounded features (kernel does bf16 matmul with
    # f32 accumulation), so the comparison is tight.
    ref = _reference_loss(img.astype(jnp.bfloat16).astype(jnp.float32),
                          txt.astype(jnp.bfloat16).astype(jnp.float32),
                          logit_scale, logit_bias)
    assert jnp.allclose(out, ref, rtol=1e-3, atol=1e-3), (out, ref)

    # Case 2: non-square batch (exercises padding + diagonal corrections).
    img2 = _make(k3, 24, 64)
    txt2 = _make(k4, 40, 64)
    out2 = jax.block_until_ready(siglip_loss(img2, txt2, logit_scale, logit_bias))
    ref2 = _reference_loss(img2.astype(jnp.bfloat16).astype(jnp.float32),
                           txt2.astype(jnp.bfloat16).astype(jnp.float32),
                           logit_scale, logit_bias)
    assert jnp.allclose(out2, ref2, rtol=1e-3, atol=1e-3), (out2, ref2)

    print("KERNEL_OK")
</pallas_src>

<mosaic_0001>
module attributes {stable_mosaic.version = 11 : i64} {
  func.func @_siglip_kernel(%arg0: i32, %arg1: i32, %arg2: memref<1x1xf32, #tpu.memory_space<smem>>, %arg3: memref<1x1xf32, #tpu.memory_space<smem>>, %arg4: memref<16x32xbf16, #tpu.memory_space<vmem>>, %arg5: memref<128x32xbf16, #tpu.memory_space<vmem>>, %arg6: memref<8x128xf32, #tpu.memory_space<vmem>>, %arg7: memref<16x128xf32, #tpu.memory_space<vmem>>) attributes {dimension_semantics = [#tpu.dimension_semantics<parallel>, #tpu.dimension_semantics<arbitrary>], iteration_bounds = array<i64: 1, 1>, scalar_prefetch = 0 : i64, scratch_operands = 1 : i64, tpu.core_type = #tpu.core_type<tc>, window_params = [{transform_indices = @transform_0, window_bounds = array<i64: 1, 1>}, {transform_indices = @transform_1, window_bounds = array<i64: 1, 1>}, {transform_indices = @transform_2, window_bounds = array<i64: 16, 32>}, {transform_indices = @transform_3, window_bounds = array<i64: 128, 32>}, {transform_indices = @transform_4, window_bounds = array<i64: 8, 128>}]} {
    %c0_i32 = arith.constant 0 : i32
    %0 = arith.cmpi eq, %arg1, %c0_i32 : i32
    %1 = arith.extui %0 : i1 to i32
    %c0_i32_0 = arith.constant 0 : i32
    %2 = arith.cmpi ne, %1, %c0_i32_0 : i32
    scf.if %2 {
      %cst_16 = arith.constant 0.000000e+00 : f32
      %26 = vector.broadcast %cst_16 : f32 to vector<16x128xf32>
      %c0_17 = arith.constant 0 : index
      %c0_18 = arith.constant 0 : index
      %27 = vector.load %arg7[%c0_17, %c0_18] : memref<16x128xf32, #tpu.memory_space<vmem>>, vector<16x128xf32>
      tpu.vector_store %arg7[%c0_17, %c0_18], %26 {strides = array<i32>} : memref<16x128xf32, #tpu.memory_space<vmem>>, vector<16x128xf32>,
    } else {
    }
    %c0 = arith.constant 0 : index
    %c0_1 = arith.constant 0 : index
    %3 = vector.load %arg4[%c0, %c0_1] : memref<16x32xbf16, #tpu.memory_space<vmem>>, vector<16x32xbf16>
    %c0_2 = arith.constant 0 : index
    %c0_3 = arith.constant 0 : index
    %4 = vector.load %arg5[%c0_2, %c0_3] : memref<128x32xbf16, #tpu.memory_space<vmem>>, vector<128x32xbf16>
    %cst = arith.constant dense<0.000000e+00> : vector<16x128xf32>
    %5 = tpu.matmul %3, %4, %cst {dimension_numbers = #tpu.dot_dimension_numbers<[1], [1], [0], [0], [0, 0, 1, 0], [], []>} : vector<16x32xbf16>, vector<128x32xbf16>, vector<16x128xf32> -> vector<16x128xf32>
    %c0_4 = arith.constant 0 : index
    %c0_5 = arith.constant 0 : index
    %6 = memref.load %arg2[%c0_4, %c0_5] : memref<1x1xf32, #tpu.memory_space<smem>>
    %c0_6 = arith.constant 0 : index
    %c0_7 = arith.constant 0 : index
    %7 = memref.load %arg3[%c0_6, %c0_7] : memref<1x1xf32, #tpu.memory_space<smem>>
    %8 = vector.broadcast %6 : f32 to vector<16x128xf32>
    %9 = arith.mulf %5, %8 : vector<16x128xf32>
    %10 = vector.broadcast %7 : f32 to vector<16x128xf32>
    %11 = arith.addf %9, %10 : vector<16x128xf32>
    %cst_8 = arith.constant 0.000000e+00 : f32
    %12 = vector.broadcast %cst_8 : f32 to vector<16x128xf32>
    %13 = arith.maximumf %11, %12 : vector<16x128xf32>
    %14 = math.absf %11 : vector<16x128xf32>
    %cst_9 = arith.constant 0.000000e+00 : f32
    %15 = vector.broadcast %cst_9 : f32 to vector<16x128xf32>
    %16 = arith.subf %15, %14 : vector<16x128xf32>
    %17 = math.exp %16 : vector<16x128xf32>
    %18 = math.log1p %17 : vector<16x128xf32>
    %19 = arith.addf %13, %18 : vector<16x128xf32>
    %c0_10 = arith.constant 0 : index
    %c0_11 = arith.constant 0 : index
    %20 = vector.load %arg7[%c0_10, %c0_11] : memref<16x128xf32, #tpu.memory_space<vmem>>, vector<16x128xf32>
    %21 = arith.addf %20, %19 : vector<16x128xf32>
    %c0_12 = arith.constant 0 : index
    %c0_13 = arith.constant 0 : index
    %22 = vector.load %arg7[%c0_12, %c0_13] : memref<16x128xf32, #tpu.memory_space<vmem>>, vector<16x128xf32>
    tpu.vector_store %arg7[%c0_12, %c0_13], %21 {strides = array<i32>} : memref<16x128xf32, #tpu.memory_space<vmem>>, vector<16x128xf32>,
    %c0_i32_14 = arith.constant 0 : i32
    %23 = arith.cmpi eq, %arg1, %c0_i32_14 : i32
    %24 = arith.extui %23 : i1 to i32
    %c0_i32_15 = arith.constant 0 : i32
    %25 = arith.cmpi ne, %24, %c0_i32_15 : i32
    scf.if %25 {
      %c0_16 = arith.constant 0 : index
      %c0_17 = arith.constant 0 : index
      %26 = vector.load %arg7[%c0_16, %c0_17] : memref<16x128xf32, #tpu.memory_space<vmem>>, vector<8x128xf32>
      %c8 = arith.constant 8 : index
      %c0_18 = arith.constant 0 : index
      %27 = vector.load %arg7[%c8, %c0_18] : memref<16x128xf32, #tpu.memory_space<vmem>>, vector<8x128xf32>
      %28 = arith.addf %26, %27 : vector<8x128xf32>
      %c0_19 = arith.constant 0 : index
      %c0_20 = arith.constant 0 : index
      %29 = vector.load %arg6[%c0_19, %c0_20] : memref<8x128xf32, #tpu.memory_space<vmem>>, vector<8x128xf32>
      tpu.vector_store %arg6[%c0_19, %c0_20], %28 {strides = array<i32>} : memref<8x128xf32, #tpu.memory_space<vmem>>, vector<8x128xf32>,
    } else {
    }
    return
  }
  func.func @transform_0(%arg0: i32, %arg1: i32) -> (i32, i32) {
    %c0_i32 = arith.constant 0 : i32
    %c0_i32_0 = arith.constant 0 : i32
    %c0_i32_1 = arith.constant 0 : i32
    return %c0_i32, %c0_i32_0 : i32, i32
  }
  func.func @transform_1(%arg0: i32, %arg1: i32) -> (i32, i32) {
    %c0_i32 = arith.constant 0 : i32
    %c0_i32_0 = arith.constant 0 : i32
    %c0_i32_1 = arith.constant 0 : i32
    return %c0_i32, %c0_i32_0 : i32, i32
  }
  func.func @transform_2(%arg0: i32, %arg1: i32) -> (i32, i32) {
    %c0_i32 = arith.constant 0 : i32
    %c0_i32_0 = arith.constant 0 : i32
    return %arg0, %c0_i32 : i32, i32
  }
  func.func @transform_3(%arg0: i32, %arg1: i32) -> (i32, i32) {
    %c0_i32 = arith.constant 0 : i32
    %c0_i32_0 = arith.constant 0 : i32
    return %arg1, %c0_i32 : i32, i32
  }
  func.func @transform_4(%arg0: i32, %arg1: i32) -> (i32, i32) {
    %c0_i32 = arith.constant 0 : i32
    %c0_i32_0 = arith.constant 0 : i32
    return %arg0, %c0_i32 : i32, i32
  }
}

</mosaic_0001>

<bundles_post_ra>
// kernel: siglip_loss.1
= control target key start
LH: loop header
LB: loop body
LE: loop exit
PB: predicated region body
PF: predicated region fallthrough
CT: control target
= control target key end

     0   :  { %vm88_vm0 = vcmask 261120   ;;  %s309_s3 = inlined_call_operand.vmem [shape: bf16[128,32], index: 3, kind: input, shape index: {}]   ;;  %s310_s2 = inlined_call_operand.vmem [shape: bf16[16,32], index: 2, kind: input, shape index: {}]   ;;  %s311_s0 = inlined_call_operand.<no memory space> [shape: f32[1,1], index: 0, kind: input, shape index: {}]   ;;  %s312_s1 = inlined_call_operand.<no memory space> [shape: f32[1,1], index: 1, kind: input, shape index: {}]   ;;  %s313_s4 = inlined_call_operand.vmem [shape: f32[8,128], index: 4, kind: output, shape index: {}]  }
   0x1   :  { %v230_v0 = vld [vmem:[%s309_s3 + $0x38] sm:$0xff]  ;;  %v229_v2 = vld [vmem:[%s309_s3 + $0x30] sm:$0xff]  ;;  %v228_v4 = vld [vmem:[%s309_s3 + $0x28] sm:$0xff]  ;;  %v132_v17 = vstv %s311_s0 }
   0x2   :  { %v114_v1 = vsel %vm88_vm0, %v230_v0, 0  ;;  %v111_v3 = vsel %vm88_vm0, %v229_v2, 0  ;;  %v108_v5 = vsel %vm88_vm0, %v228_v4, 0  ;;  %v227_v6 = vld [vmem:[%s309_s3 + $0x20] sm:$0xff]  ;;  %v226_v8 = vld [vmem:[%s309_s3 + $0x18] sm:$0xff]  ;;  %v225_v10 = vld [vmem:[%s309_s3 + $0x10] sm:$0xff]  ;;  %v135_v19 = vstv %s312_s1 }
   0x3   :  { %116 = vmatpush.bf16.xpose.msra.mxu0 %v114_v1  ;;  %v105_v7 = vsel %vm88_vm0, %v227_v6, 0  ;;  %v102_v9 = vsel %vm88_vm0, %v226_v8, 0  ;;  %v99_v11 = vsel %vm88_vm0, %v225_v10, 0  ;;  %v224_v12 = vld [vmem:[%s309_s3 + $0x8] sm:$0xff]  ;;  %v223_v14 = vld [vmem:[%s309_s3] sm:$0xff] }
   0x4   :  { %v96_v13 = vsel %vm88_vm0, %v224_v12, 0  ;;  %v93_v15 = vsel %vm88_vm0, %v223_v14, 0  ;;  %v222_v16 = vld [vmem:[%s310_s2] sm:$0xff] }
   0xb   :  { %117 = vmatpush.bf16.xpose.msra.mxu0 %v111_v3 }
  0x13   :  { %118 = vmatpush.bf16.xpose.msra.mxu0 %v108_v5 }
  0x1b   :  { %119 = vmatpush.bf16.xpose.msra.mxu0 %v105_v7 }
  0x23   :  { %120 = vmatpush.bf16.xpose.msra.mxu0 %v102_v9 }
  0x2b   :  { %121 = vmatpush.bf16.xpose.msra.mxu0 %v99_v11 }
  0x33   :  { %122 = vmatpush.bf16.xpose.msra.mxu0 %v96_v13 }
  0x3b   :  { %123 = vmatpush.bf16.xpose.msra.mxu0 %v93_v15 }
  0x42   :  { %221 = vmatmul.msk.bf16.vlgmr.msra.gmra.mxu0 %vm88_vm0, %v222_v16 }
  0xbf   :  { %v125_v18 = vpop.f32.mrf.mxu0 }
  0xc0   :  { %v133_v20 = vmul.f32 %v132_v17, %v125_v18 }
  0xc2   :  { %v136_v21 = vadd.f32 %v135_v19, %v133_v20 }
  0xc4   :  { %v140_v22 = vand.u32 2147483647, %v136_v21  ;;  %v138_v48 = vmax.f32 %v136_v21, 0.0 }
  0xc6   :  { %v142_v23 = vsub.f32 0.0, %v140_v22 }
  0xc7   :  { %v127_v24 = vpop.f32.mrf.mxu0 }
  0xc8   :  { %v144_v25 = vmul.f32 1.442695, %v142_v23  ;;  %v134_v26 = vmul.f32 %v132_v17, %v127_v24 }
  0xca   :  { %231 = vpow2.f32 %v144_v25  ;;  %v137_v27 = vadd.f32 %v135_v19, %v134_v26 }
  0xcc   :  { %v141_v28 = vand.u32 2147483647, %v137_v27  ;;  %v139_v49 = vmax.f32 %v137_v27, 0.0 }
  0xce   :  { %v143_v29 = vsub.f32 0.0, %v141_v28 }
  0xd0   :  { %v232_v30 = vpop.eup %231  ;;  %v146_v31 = vmul.f32 1.442695, %v143_v29 }
  0xd1   :  { %v148_v32 = vadd.f32 1.0, %v232_v30  ;;  %v151_v34 = vmul.f32 -0.5, %v232_v30  ;;  %v154_v39 = vand.u32 2147483647, %v232_v30 }
  0xd2   :  { %233 = vpow2.f32 %v146_v31 }
  0xd3   :  { %235 = vlog2.f32 %v148_v32  ;;  %v152_v38 = vadd.f32 1.0, %v151_v34  ;;  %vm155_vm1 = vcmp.lt.f32.partialorder %v154_v39, 0.0004427343 }
  0xd5   :  { %v153_v43 = vmul.f32 %v232_v30, %v152_v38 }
  0xd8   :  { %v234_v33 = vpop.eup %233 }
  0xd9   :  { %v157_v35 = vadd.f32 1.0, %v234_v33  ;;  %v160_v36 = vmul.f32 -0.5, %v234_v33  ;;  %v236_v37 = vpop.eup %235  ;;  %v163_v42 = vand.u32 2147483647, %v234_v33 }
  0xda   :  { %v150_v40 = vmul.f32 0.6931472, %v236_v37 }
  0xdb   :  { %237 = vlog2.f32 %v157_v35  ;;  %v161_v41 = vadd.f32 1.0, %v160_v36  ;;  %vm164_vm2 = vcmp.lt.f32.partialorder %v163_v42, 0.0004427343 }
  0xdc   :  { %v156_v45 = vsel %vm155_vm1, %v153_v43, %v150_v40 }
  0xdd   :  { %v162_v47 = vmul.f32 %v234_v33, %v161_v41  ;;  %v166_v51 = vadd.f32 %v156_v45, %v138_v48 }
  0xe1   :  { %v238_v44 = vpop.eup %237 }
  0xe2   :  { %v159_v46 = vmul.f32 0.6931472, %v238_v44 }
  0xe4   :  { %v165_v50 = vsel %vm164_vm2, %v162_v47, %v159_v46 }
  0xe5   :  { %v167_v52 = vadd.f32 %v165_v50, %v139_v49 }
  0xe7   :  { %v179_v53 = vadd.f32 %v167_v52, %v166_v51 }
  0xe9   :  { %180 = vst [vmem:[%s313_s4] sm:$0xff] %v179_v53 }

</bundles_post_ra>
